<compile_context>
chip_gen: v6e
topology: v6e:2x2x1
jax: 0.10.0
libtpu: 0.0.40
codegen_flags: <defaults>
</compile_context>

<pallas_src>
import functools

import jax
import jax.numpy as jnp
from jax.experimental import pallas as pl
from jax.experimental.pallas import tpu as pltpu

LANES = 128
SUBLANES = 8


def _charbonnier_partial_kernel(x_ref, y_ref, out_ref, *, eps2):
    # (tile_rows, 128) block -> (8, 128) partial sum of sqrt(diff^2 + eps^2).
    diff = x_ref[...].astype(jnp.float32) - y_ref[...].astype(jnp.float32)
    val = jnp.sqrt(diff * diff + jnp.float32(eps2))
    t = val.shape[0]
    # Fold sublane groups: (t, 128) -> (t//8, 8, 128) and add over the leading
    # axis — pure VPU vreg adds, no cross-lane XLU reduce in the hot loop.
    out_ref[...] = jnp.sum(val.reshape(t // SUBLANES, SUBLANES, LANES), axis=0)


def charbonnier_loss(x, y, eps=1e-3, tile_rows=1024):
    """Pallas implementation of CharbonnierLoss.forward (reduction='mean')."""
    assert x.shape == y.shape, "x and y must have the same shape"
    n = x.size
    eps2 = float(eps) * float(eps)

    xf = jnp.reshape(x, (-1,))
    yf = jnp.reshape(y, (-1,))

    # Sublane granularity from element packing: 8 rows for 4-byte dtypes,
    # 16 for bf16/f16, 32 for 1-byte dtypes.
    itemsize = int(x.dtype.itemsize)
    sub = max(SUBLANES, 32 // max(itemsize, 1))

    rows_total = n // LANES
    total = jnp.float32(0.0)
    n_main = 0

    if rows_total >= sub:
        tr = min(int(tile_rows), rows_total)
        tr = max(sub, (tr // sub) * sub)          # multiple of sublane packing
        rows_main = (rows_total // tr) * tr       # tile-aligned prefix
        n_main = rows_main * LANES
        num_blocks = rows_main // tr

        x2 = xf[:n_main].reshape(rows_main, LANES)
        y2 = yf[:n_main].reshape(rows_main, LANES)

        partials = pl.pallas_call(
            functools.partial(_charbonnier_partial_kernel, eps2=eps2),
            out_shape=jax.ShapeDtypeStruct(
                (num_blocks * SUBLANES, LANES), jnp.float32),
            grid_spec=pltpu.PrefetchScalarGridSpec(
                num_scalar_prefetch=0,
                grid=(num_blocks,),
                in_specs=[
                    pl.BlockSpec((tr, LANES), lambda i: (i, 0)),
                    pl.BlockSpec((tr, LANES), lambda i: (i, 0)),
                ],
                out_specs=pl.BlockSpec((SUBLANES, LANES), lambda i: (i, 0)),
            ),
            compiler_params=pltpu.CompilerParams(
                dimension_semantics=("parallel",),   # independent partials
            ),
        )(x2, y2)
        total = total + jnp.sum(partials, dtype=jnp.float32)

    if n_main < n:
        # < one tile of trailing elements (or tiny inputs): plain JAX sum.
        dt = xf[n_main:].astype(jnp.float32) - yf[n_main:].astype(jnp.float32)
        total = total + jnp.sum(jnp.sqrt(dt * dt + jnp.float32(eps2)))

    # Mean over the true element count, matching torch.mean.
    return (total / jnp.float32(n)).astype(jnp.float32)


if __name__ == "__main__":
    key = jax.random.PRNGKey(0)
    kx, ky = jax.random.split(key)
    shape = (2, 4, 16, 16)  # NCHW, small test shape
    x = jax.random.normal(kx, shape, dtype=jnp.float32)
    y = jax.random.normal(ky, shape, dtype=jnp.float32)

    loss = charbonnier_loss(x, y, eps=1e-3)
    loss = jax.block_until_ready(loss)

    # Reference check in plain JAX.
    diff = x - y
    ref = jnp.mean(jnp.sqrt(diff * diff + jnp.float32(1e-3 * 1e-3)))
    assert jnp.allclose(loss, ref, rtol=1e-5, atol=1e-6), (loss, ref)

    print("KERNEL_OK")
</pallas_src>

<mosaic_0001>
module attributes {stable_mosaic.version = 11 : i64} {
  func.func @_charbonnier_partial_kernel(%arg0: i32, %arg1: memref<16x128xf32, #tpu.memory_space<vmem>>, %arg2: memref<16x128xf32, #tpu.memory_space<vmem>>, %arg3: memref<8x128xf32, #tpu.memory_space<vmem>>) attributes {dimension_semantics = [#tpu.dimension_semantics<parallel>], iteration_bounds = array<i64: 1>, scalar_prefetch = 0 : i64, scratch_operands = 0 : i64, tpu.core_type = #tpu.core_type<tc>, window_params = [{transform_indices = @transform_0, window_bounds = array<i64: 16, 128>}, {transform_indices = @transform_1, window_bounds = array<i64: 16, 128>}, {transform_indices = @transform_2, window_bounds = array<i64: 8, 128>}]} {
    %c0 = arith.constant 0 : index
    %c0_0 = arith.constant 0 : index
    %0 = vector.load %arg1[%c0, %c0_0] : memref<16x128xf32, #tpu.memory_space<vmem>>, vector<16x128xf32>
    %c0_1 = arith.constant 0 : index
    %c0_2 = arith.constant 0 : index
    %1 = vector.load %arg2[%c0_1, %c0_2] : memref<16x128xf32, #tpu.memory_space<vmem>>, vector<16x128xf32>
    %2 = arith.subf %0, %1 : vector<16x128xf32>
    %3 = arith.mulf %2, %2 : vector<16x128xf32>
    %cst = arith.constant 9.99999997E-7 : f32
    %4 = vector.broadcast %cst : f32 to vector<16x128xf32>
    %5 = arith.addf %3, %4 : vector<16x128xf32>
    %6 = math.sqrt %5 : vector<16x128xf32>
    %7 = vector.shape_cast %6 : vector<16x128xf32> to vector<2x8x128xf32>
    %cst_3 = arith.constant dense<0.000000e+00> : vector<8x128xf32>
    %8 = vector.multi_reduction <add>, %7, %cst_3 [0] : vector<2x8x128xf32> to vector<8x128xf32>
    %c0_4 = arith.constant 0 : index
    %c0_5 = arith.constant 0 : index
    %9 = vector.load %arg3[%c0_4, %c0_5] : memref<8x128xf32, #tpu.memory_space<vmem>>, vector<8x128xf32>
    tpu.vector_store %arg3[%c0_4, %c0_5], %8 {strides = array<i32>} : memref<8x128xf32, #tpu.memory_space<vmem>>, vector<8x128xf32>,
    return
  }
  func.func @transform_0(%arg0: i32) -> (i32, i32) {
    %c0_i32 = arith.constant 0 : i32
    %c0_i32_0 = arith.constant 0 : i32
    return %arg0, %c0_i32 : i32, i32
  }
  func.func @transform_1(%arg0: i32) -> (i32, i32) {
    %c0_i32 = arith.constant 0 : i32
    %c0_i32_0 = arith.constant 0 : i32
    return %arg0, %c0_i32 : i32, i32
  }
  func.func @transform_2(%arg0: i32) -> (i32, i32) {
    %c0_i32 = arith.constant 0 : i32
    %c0_i32_0 = arith.constant 0 : i32
    return %arg0, %c0_i32 : i32, i32
  }
}

</mosaic_0001>

<bundles_post_ra>
// kernel: tpu_custom_call.1
= control target key start
LH: loop header
LB: loop body
LE: loop exit
PB: predicated region body
PF: predicated region fallthrough
CT: control target
= control target key end

     0   :  { %7 = vsyncpa [#allocation3], 0  ;;  %s186_s0 = inlined_call_operand.hbm [shape: f32[16,128], index: 0, kind: input, shape index: {}]   ;;  %s187_s1 = inlined_call_operand.hbm [shape: f32[16,128], index: 1, kind: input, shape index: {}]   ;;  %s188_s2 = inlined_call_operand.hbm [shape: f32[8,128], index: 2, kind: output, shape index: {}]  }
   0x1   :  { %8 = vsyncpa [#allocation6], 0 }
   0x2   :  { %9 = vsyncpa [#allocation4], 0  ;;  %s157_s9 = smov [#allocation2]  }
   0x3   :  { %s15_s10 = sshll.u32 %s157_s9, 4  ;;  %s16_s10 = int_to_ptr.vmem [resolvable:$true] %s15_s10 }
   0x4   :  { %s99_s11 = scalar_lea.vmem %s16_s10, 256  ;;  %p104_p1 = scmp.lt.s32.totalorder %s16_s10, %s16_s10 }
   0x5   :  { %p100_p0 = scmp.ne.s32.totalorder %s16_s10, %s99_s11  ;;  %p105_p2 = scmp.lt.s32.totalorder %s99_s11, %s99_s11 }
   0x7   :  { %p106_p3 = por %p105_p2, %p104_p1 }
   0x9   :  { %p107_p4 = pnand %p106_p3, %p100_p0 }
   0xb   :  { %110 = shalt.err (!%p107_p4)
}
   0xc   :  { %s158_s12 = smov 128   ;;  %s159_s13 = smov 8  }
   0xd   :  { %21 = dma.hbm_to_vmem [thread:$0]  %s186_s0, 256, %s16_s10, [#allocation3], %s158_s12, %s158_s12, %s159_s13  }
   0xe   :  { %s160_s16 = smov [#allocation5]  }
   0xf   :  { %s27_s17 = sshll.u32 %s160_s16, 4  ;;  %s28_s17 = int_to_ptr.vmem [resolvable:$true] %s27_s17 }
  0x10   :  { %s119_s18 = scalar_lea.vmem %s28_s17, 256  ;;  %p124_p6 = scmp.lt.s32.totalorder %s28_s17, %s28_s17 }
  0x11   :  { %p120_p5 = scmp.ne.s32.totalorder %s28_s17, %s119_s18  ;;  %p125_p7 = scmp.lt.s32.totalorder %s119_s18, %s119_s18 }
  0x13   :  { %p126_p8 = por %p125_p7, %p124_p6 }
  0x15   :  { %p127_p9 = pnand %p126_p8, %p120_p5 }
  0x17   :  { %130 = shalt.err (!%p127_p9)
}
  0x18   :  { %33 = dma.hbm_to_vmem [thread:$0]  %s187_s1, 256, %s28_s17, [#allocation6], %s158_s12, %s158_s12, %s159_s13  }
  0x19   :  { %151 = dma.done.wait [#allocation3], 256  }
  0x1a   :  { %152 = vsyncadd [#allocation3], 4294967040 }
  0x1b   :  { %153 = dma.done.wait [#allocation6], 256  }
  0x1c   :  { %154 = vsyncadd [#allocation6], 4294967040  ;;  %v40_v0 = vld [vmem:[#allocation2] sm:$0xff]  ;;  %v41_v1 = vld [vmem:[#allocation2 + $0x8] sm:$0xff]  ;;  %s161_s0 = smov [#allocation7]  }
  0x1d   :  { %v42_v2 = vld [vmem:[#allocation5] sm:$0xff]  ;;  %v43_v3 = vld [vmem:[#allocation5 + $0x8] sm:$0xff]  ;;  %s72_s1 = sshll.u32 %s161_s0, 4  ;;  %s73_s1 = int_to_ptr.vmem [resolvable:$true] %s72_s1 }
  0x1e   :  { %v44_v4 = vsub.f32 %v40_v0, %v42_v2  ;;  %v45_v5 = vsub.f32 %v41_v1, %v43_v3  ;;  %s131_s21 = scalar_lea.vmem %s73_s1, 128  ;;  %p136_p11 = scmp.lt.s32.totalorder %s73_s1, %s73_s1 }
  0x1f   :  { %p132_p10 = scmp.ne.s32.totalorder %s73_s1, %s131_s21  ;;  %p137_p12 = scmp.lt.s32.totalorder %s131_s21, %s131_s21 }
  0x20   :  { %v46_v6 = vmul.f32 %v44_v4, %v44_v4  ;;  %v47_v7 = vmul.f32 %v45_v5, %v45_v5 }
  0x21   :  { %p138_p13 = por %p137_p12, %p136_p11 }
  0x22   :  { %v48_v8 = vadd.f32 1e-06, %v46_v6  ;;  %v49_v9 = vadd.f32 1e-06, %v47_v7 }
  0x23   :  { %p139_p0 = pnand %p138_p13, %p132_p10 }
  0x24   :  { %87 = vrsqrt.f32 %v48_v8  ;;  %vm52_vm0 = vcmp.eq.f32.partialorder %v48_v8, inf  ;;  %v55_v11 = vand.u32 2147483648, %v48_v8  ;;  %vm54_vm1 = vcmp.eq.f32.partialorder %v48_v8, 0.0 }
  0x25   :  { %89 = vrsqrt.f32 %v49_v9  ;;  %vm59_vm2 = vcmp.eq.f32.partialorder %v49_v9, inf  ;;  %v62_v14 = vand.u32 2147483648, %v49_v9  ;;  %vm61_vm3 = vcmp.eq.f32.partialorder %v49_v9, 0.0 }
  0x31   :  { %v88_v10 = vpop.eup %87 }
  0x32   :  { %v90_v12 = vpop.eup %89  ;;  %v51_v13 = vmul.f32 %v88_v10, %v48_v8 }
  0x33   :  { %v58_v15 = vmul.f32 %v90_v12, %v49_v9 }
  0x34   :  { %v53_v16 = vsel %vm52_vm0, %v48_v8, %v51_v13 }
  0x35   :  { %v56_v17 = vsel %vm54_vm1, %v55_v11, %v53_v16  ;;  %v60_v18 = vsel %vm59_vm2, %v49_v9, %v58_v15 }
  0x36   :  { %v63_v19 = vsel %vm61_vm3, %v62_v14, %v60_v18 }
  0x37   :  { %v64_v20 = vadd.f32 %v63_v19, %v56_v17 }
  0x39   :  { %65 = vst [vmem:[#allocation7] sm:$0xff] %v64_v20 }
  0x3a   :  { %142 = shalt.err (!%p139_p0)
}
  0x3b   :  { %75 = dma.vmem_to_hbm [thread:$0]  %s73_s1, 128, %s188_s2, [#allocation4]  }
  0x3c   :  { %155 = dma.done.wait [#allocation4], 128  }
  0x3d   :  { %156 = vsyncadd [#allocation4], 4294967168 }
  0x3e   :  { %79 = vsyncpa [#allocation3], 1 }
  0x3f   :  { %80 = vsyncpa [#allocation6], 1 }
  0x40   :  { %81 = vsyncpa [#allocation4], 1 }

</bundles_post_ra>
